<compile_context>
chip_gen: v5e
topology: v5e:2x2
jax: 0.10.0
libtpu: 0.0.40
codegen_flags: <defaults>
</compile_context>

<pallas_src>
import functools

import jax
import jax.numpy as jnp
from jax import lax
from jax.experimental import pallas as pl
from jax.experimental.pallas import tpu as pltpu

GROUP = 8   # rows gathered / gated / stored per group (one full sublane tile)
NBUF = 3    # gather pipeline depth (NBUF-1 groups in flight while gating one)


def _round_up(x, m):
    return ((x + m - 1) // m) * m


def _vmem_capacity_bytes():
    """Physical VMEM of this TPU generation (64 MiB v7x, 128 MiB v5e/v6e)."""
    try:
        info = pltpu.get_tpu_info()
        return int(getattr(info, "vmem_capacity_bytes", 64 << 20))
    except Exception:
        return 64 << 20


def _vmem_limit_bytes(cap):
    return int(min(cap // 2, 64 << 20))       # 32 MiB on v7x, 64 MiB on v5e/v6e


def _block_budget_bytes(cap):
    # ~1-8 MiB per pipelined block (>=1 MiB keeps the pass near HBM roofline),
    # scaled down on v7x's smaller VMEM.
    return int(max(1 << 20, min(8 << 20, cap // 16)))


# ---------------- Pallas kernel 1: projection scores (row-tiled) -------------
def _score_kernel(inv_norm_ref, x_ref, w_ref, y_ref):
    # inv_norm_ref: SMEM (1,)  f32   -- 1/||W||, hoisted (computed once per call)
    # x_ref       : VMEM (TM,F) f32  -- row tile of node features
    # w_ref       : VMEM (1,F)  f32  -- projection weight
    # y_ref       : VMEM (TM,1) f32  -- scores for this row tile
    x = x_ref[...]
    w = w_ref[...]                                   # (1, F) broadcasts over rows
    # VPU broadcast-multiply + XLU lane reduce; the pass is HBM-bound, so avoid
    # exercising the MXU for a 1-wide result.
    # TODO(synk): for F < ~128 the (TM,1) output stores are lane-masked; a
    #             lane-major score scratch + one transpose would reclaim them.
    y_ref[...] = jnp.sum(x * w, axis=-1, keepdims=True) * inv_norm_ref[0]


def compute_scores(xl, w):
    """y = (xl @ w.T) / ||w||, tiled over rows of xl (no padding copy of xl)."""
    N, F = xl.shape
    cap = _vmem_capacity_bytes()
    blk = _block_budget_bytes(cap)
    itemsize = 4  # f32 features in-kernel

    # Biggest multiple-of-8 row tile whose (TM, F) f32 input block fits the
    # per-block budget (double-buffered by the pipeline).
    tm = max(GROUP, (blk // (F * itemsize)) // GROUP * GROUP)

    n_rows = N
    pad_rows = 0
    if N >= GROUP:
        tm = min(tm, (N // GROUP) * GROUP)   # block never exceeds the array
    else:
        # Tiny-N corner: pad up to one sublane tile (negligible traffic).
        pad_rows = GROUP - N
        xl = jnp.pad(xl, ((0, pad_rows), (0, 0)))
        n_rows = GROUP
        tm = GROUP

    grid = (pl.cdiv(n_rows, tm),)

    # Hoisted weight norm (once per call), rsqrt instead of 1/sqrt.
    inv_norm = lax.rsqrt(jnp.sum(jnp.square(w.astype(jnp.float32)))).reshape(1)

    y = pl.pallas_call(
        _score_kernel,
        out_shape=jax.ShapeDtypeStruct((n_rows, 1), jnp.float32),
        grid=grid,
        in_specs=[
            pl.BlockSpec(memory_space=pltpu.MemorySpace.SMEM),     # inv_norm
            pl.BlockSpec((tm, F), lambda i: (i, 0)),               # xl row tile
            pl.BlockSpec((1, F), lambda i: (0, 0)),                # weight
        ],
        out_specs=pl.BlockSpec((tm, 1), lambda i: (i, 0)),
        compiler_params=pltpu.CompilerParams(
            dimension_semantics=("parallel",),        # shards rows on v7x 2-TC
            vmem_limit_bytes=_vmem_limit_bytes(cap),
        ),
    )(inv_norm, xl.astype(jnp.float32), w.astype(jnp.float32))
    return y[:N] if pad_rows else y


# ---------------- Pallas kernel 2: top-k row gather + fused sigmoid gate -----
def _pool_kernel(k_total, rt, idx_ref, y_ref, x_hbm, o_ref, buf, sem):
    # k_total: python int -- total (8-padded) number of selected rows
    # rt     : python int -- rows per output tile (multiple of 8)
    # idx_ref: SMEM (k_total,) int32 -- top-k node indices (whole array)
    # y_ref  : VMEM (rt,1)  f32      -- top-k raw scores for this tile
    # x_hbm  : ANY  (N,F)            -- node features, left in HBM
    # o_ref  : VMEM (rt,F)           -- pooled, gated node features (this tile)
    # buf    : VMEM (NBUF*8,F)       -- multi-buffered 8-row landing zones
    # sem    : DMA sems (NBUF,)
    t = pl.program_id(0)
    row0 = t * rt                                        # abs first row of tile
    n_rows = jnp.minimum(rt, k_total - row0)             # ragged last tile
    n_groups = n_rows // GROUP                           # k_total, rt are 8-aligned

    def fetch(g):
        # 8 back-to-back row DMAs into consecutive sublanes of one slot; the
        # SMEM index reads happen before any .wait() on this group.
        slot = lax.rem(g, NBUF)
        base = pl.multiple_of(slot * GROUP, GROUP)
        for r in range(GROUP):
            src_row = idx_ref[row0 + g * GROUP + r]
            pltpu.make_async_copy(
                x_hbm.at[pl.ds(src_row, 1), :],
                buf.at[pl.ds(base + r, 1), :],
                sem.at[slot],
            ).start()

    # Prime up to NBUF-1 groups (>=2 groups / 16 rows in flight in steady state).
    def prime_body(j, c):
        fetch(j)
        return c

    lax.fori_loop(0, jnp.minimum(NBUF - 1, n_groups), prime_body, 0)

    def body(g, c):
        slot = lax.rem(g, NBUF)
        base = pl.multiple_of(slot * GROUP, GROUP)

        @pl.when(g + (NBUF - 1) < n_groups)
        def _():
            fetch(g + (NBUF - 1))     # refill the slot consumed last iteration

        # Aggregate wait: the 8 started (1,F) row copies sum to exactly one
        # (GROUP,F) slot in bytes (same src/dst/sem-byte accounting pattern as
        # the reference paged-attention kernels).
        pltpu.make_async_copy(
            buf.at[pl.ds(base, GROUP), :],
            buf.at[pl.ds(base, GROUP), :],
            sem.at[slot],
        ).wait()

        off = pl.multiple_of(g * GROUP, GROUP)
        # One sigmoid per 8-row group (EUP slot), one unmasked full-sublane store.
        gate = jax.nn.sigmoid(y_ref[pl.ds(off, GROUP), :])            # (8,1)
        rows = buf[pl.ds(base, GROUP), :]                             # (8,F)
        o_ref[pl.ds(off, GROUP), :] = (rows * gate).astype(o_ref.dtype)
        return c

    lax.fori_loop(0, n_groups, body, 0)


def pool_gather(top_idxs, topk_values, xl):
    """xl1 = xl[top_idxs] * sigmoid(topk_values); only k rows leave HBM."""
    N, F = xl.shape
    k = int(top_idxs.shape[0])
    itemsize = xl.dtype.itemsize

    # Pad the selection to a multiple of 8 so every group is full (at most 7
    # extra gathered rows; sliced off the output below).
    k_pad = _round_up(k, GROUP)
    if k_pad != k:
        top_idxs = jnp.pad(top_idxs, (0, k_pad - k))        # pads with node 0
        topk_values = jnp.pad(topk_values, (0, k_pad - k))

    cap = _vmem_capacity_bytes()
    blk = _block_budget_bytes(cap)
    # Rows per output tile: multiple of 8, <= ~512, (rt,F) out block within the
    # VMEM budget, never exceeding k_pad.
    rt = max(GROUP, min(512, (blk // (F * itemsize)) // GROUP * GROUP))
    rt = min(rt, k_pad)
    num_tiles = pl.cdiv(k_pad, rt)

    scores = topk_values.reshape(k_pad, 1).astype(jnp.float32)

    out = pl.pallas_call(
        functools.partial(_pool_kernel, k_pad, rt),
        out_shape=jax.ShapeDtypeStruct((k_pad, F), xl.dtype),
        grid=(num_tiles,),
        in_specs=[
            pl.BlockSpec(memory_space=pltpu.MemorySpace.SMEM),   # indices (whole)
            pl.BlockSpec((rt, 1), lambda t: (t, 0)),             # scores tile
            pl.BlockSpec(memory_space=pl.ANY),                   # xl stays in HBM
        ],
        out_specs=pl.BlockSpec((rt, F), lambda t: (t, 0)),
        scratch_shapes=[
            pltpu.VMEM((NBUF * GROUP, F), xl.dtype),
            pltpu.SemaphoreType.DMA((NBUF,)),
        ],
        compiler_params=pltpu.CompilerParams(
            dimension_semantics=("parallel",),    # tiles split across v7x 2 TCs
            vmem_limit_bytes=_vmem_limit_bytes(cap),
        ),
    )(top_idxs.astype(jnp.int32), scores, xl)
    return out[:k] if k_pad != k else out


# ---------------- full GPool forward ------------------------------------------
def gpool_forward(xl, edge_index, weight, ratio):
    N, F = xl.shape
    # hot path 1: score = Linear(xl) / ||W||   (Pallas, tiled over rows)
    y = compute_scores(xl, weight)                            # (N, 1) f32
    k = int(ratio * N)
    if k == 0:
        return (jnp.zeros((0, F), xl.dtype),
                jnp.zeros((2, 0), jnp.int32),
                jnp.zeros((0,), jnp.int32))

    # TODO(synk): top-k sort (data-dependent ordering) stays in plain JAX.
    topk_values, top_idxs = lax.top_k(y[:, 0], k)
    top_idxs = top_idxs.astype(jnp.int32)
    # hot path 2: xl1 = xl[top_idxs] * sigmoid(topk_values)   (Pallas gather)
    xl1 = pool_gather(top_idxs, topk_values, xl)              # (k, F)

    # Pooled edge_index via O(E+N) edge filtering with the inverse permutation
    # (replaces the O(N^2) dense adjacency + nonzero).  Output shape is
    # data-dependent, so this glue runs eagerly (not jittable, not Pallas).
    inv = jnp.full((N,), -1, dtype=jnp.int32).at[top_idxs].set(
        jnp.arange(k, dtype=jnp.int32))
    src_m = inv[edge_index[0]]
    dst_m = inv[edge_index[1]]
    keep = (src_m >= 0) & (dst_m >= 0)
    src_p = src_m[keep]
    dst_p = dst_m[keep]
    # coalesce(): dedupe + lexicographic (row-major) sort.
    lin = jnp.unique(src_p * k + dst_p)
    edge_index_pool = jnp.stack([lin // k, lin % k]).astype(jnp.int32)
    return xl1, edge_index_pool, top_idxs


if __name__ == "__main__":
    key = jax.random.PRNGKey(0)
    k_x, k_w, k_s, k_d = jax.random.split(key, 4)

    N, F = 16, 32            # num nodes, num features
    ratio = 0.5
    E = 24                   # num edges

    xl = jax.random.normal(k_x, (N, F), dtype=jnp.float32)
    # deterministic init of nn.Linear(num_f, 1, bias=False).weight -> (1, F)
    weight = (jax.random.normal(k_w, (1, F), dtype=jnp.float32)
              * (1.0 / jnp.sqrt(jnp.float32(F))))
    src = jax.random.randint(k_s, (E,), 0, N, dtype=jnp.int32)
    dst = jax.random.randint(k_d, (E,), 0, N, dtype=jnp.int32)
    edge_index = jnp.stack([src, dst])

    xl1, edge_index_pool, top_idxs = gpool_forward(xl, edge_index, weight, ratio)
    jax.block_until_ready((xl1, edge_index_pool, top_idxs))

    # pure-JAX reference for the Pallas-computed parts
    y_ref = (xl @ weight.T) / jnp.linalg.norm(weight)
    tv, ti = lax.top_k(y_ref[:, 0], int(ratio * N))
    xl1_ref = xl[ti, :] * jax.nn.sigmoid(tv)[:, None]
    assert jnp.allclose(xl1, xl1_ref, atol=1e-5), "xl1 mismatch vs reference"
    assert jnp.array_equal(top_idxs, ti.astype(jnp.int32)), "top_idxs mismatch"

    # reference pooled edges via the dense-adjacency path (matches row-major
    # ordering of the coalesced sparse indices)
    al = jnp.zeros((N, N), jnp.float32).at[edge_index[0], edge_index[1]].add(1.0)
    al1 = al[ti][:, ti]
    r_src, r_dst = jnp.nonzero(al1)
    ref_edges = jnp.stack([r_src, r_dst]).astype(jnp.int32)
    assert jnp.array_equal(edge_index_pool, ref_edges), "edge_index_pool mismatch"

    print("KERNEL_OK")
</pallas_src>

<mosaic_0001>
module attributes {stable_mosaic.version = 11 : i64} {
  func.func @_score_kernel(%arg0: i32, %arg1: memref<1xf32, #tpu.memory_space<smem>>, %arg2: memref<16x32xf32, #tpu.memory_space<vmem>>, %arg3: memref<1x32xf32, #tpu.memory_space<vmem>>, %arg4: memref<16x1xf32, #tpu.memory_space<vmem>>) attributes {dimension_semantics = [#tpu.dimension_semantics<parallel>], iteration_bounds = array<i64: 1>, scalar_prefetch = 0 : i64, scratch_operands = 0 : i64, tpu.core_type = #tpu.core_type<tc>, window_params = [{transform_indices = @transform_0, window_bounds = array<i64: 1>}, {transform_indices = @transform_1, window_bounds = array<i64: 16, 32>}, {pipeline_mode = #tpu.pipeline_mode<synchronous>, transform_indices = @transform_2, window_bounds = array<i64: 1, 32>}, {transform_indices = @transform_3, window_bounds = array<i64: 16, 1>}]} {
    %c0 = arith.constant 0 : index
    %c0_0 = arith.constant 0 : index
    %0 = vector.load %arg2[%c0, %c0_0] : memref<16x32xf32, #tpu.memory_space<vmem>>, vector<16x32xf32>
    %c0_1 = arith.constant 0 : index
    %c0_2 = arith.constant 0 : index
    %1 = vector.load %arg3[%c0_1, %c0_2] : memref<1x32xf32, #tpu.memory_space<vmem>>, vector<1x32xf32>
    %2 = vector.broadcast %1 : vector<1x32xf32> to vector<16x32xf32>
    %3 = arith.mulf %0, %2 : vector<16x32xf32>
    %cst = arith.constant dense<0.000000e+00> : vector<16xf32>
    %4 = vector.multi_reduction <add>, %3, %cst [1] : vector<16x32xf32> to vector<16xf32>
    %5 = vector.shape_cast %4 : vector<16xf32> to vector<16x1xf32>
    %c0_3 = arith.constant 0 : index
    %6 = memref.load %arg1[%c0_3] : memref<1xf32, #tpu.memory_space<smem>>
    %7 = vector.broadcast %6 : f32 to vector<16x1xf32>
    %8 = arith.mulf %5, %7 : vector<16x1xf32>
    %c0_4 = arith.constant 0 : index
    %c0_5 = arith.constant 0 : index
    %9 = vector.load %arg4[%c0_4, %c0_5] : memref<16x1xf32, #tpu.memory_space<vmem>>, vector<16x1xf32>
    tpu.vector_store %arg4[%c0_4, %c0_5], %8 {strides = array<i32>} : memref<16x1xf32, #tpu.memory_space<vmem>>, vector<16x1xf32>,
    return
  }
  func.func @transform_0(%arg0: i32) -> i32 {
    %c0_i32 = arith.constant 0 : i32
    %c0_i32_0 = arith.constant 0 : i32
    return %c0_i32 : i32
  }
  func.func @transform_1(%arg0: i32) -> (i32, i32) {
    %c0_i32 = arith.constant 0 : i32
    %c0_i32_0 = arith.constant 0 : i32
    return %arg0, %c0_i32 : i32, i32
  }
  func.func @transform_2(%arg0: i32) -> (i32, i32) {
    %c0_i32 = arith.constant 0 : i32
    %c0_i32_0 = arith.constant 0 : i32
    %c0_i32_1 = arith.constant 0 : i32
    return %c0_i32, %c0_i32_0 : i32, i32
  }
  func.func @transform_3(%arg0: i32) -> (i32, i32) {
    %c0_i32 = arith.constant 0 : i32
    %c0_i32_0 = arith.constant 0 : i32
    return %arg0, %c0_i32 : i32, i32
  }
}

</mosaic_0001>

<bundles_post_ra>
// kernel: tpu_custom_call.1
= control target key start
LH: loop header
LB: loop body
LE: loop exit
PB: predicated region body
PF: predicated region fallthrough
CT: control target
= control target key end

     0   :  { %9 = vsyncpa [#allocation4], 0  ;;  %s88_s15 = smov [#allocation3]   ;;  %s89_s17 = smov 128   ;;  %s126_s0 = inlined_call_operand.<no memory space> [shape: f32[1], index: 0, kind: input, shape index: {}]   ;;  %s127_s1 = inlined_call_operand.hbm [shape: f32[16,32], index: 1, kind: input, shape index: {}]   ;;  %s128_s2 = inlined_call_operand.vmem [shape: f32[1,32], index: 2, kind: input, shape index: {}]   ;;  %s129_s3 = inlined_call_operand.vmem [shape: f32[16,1], index: 3, kind: output, shape index: {}]  }
   0x1   :  { %s16_s14 = sshll.u32 %s127_s1, 4  ;;  %s18_s16 = sshll.u32 %s88_s15, 4  ;;  %s17_s14 = int_to_ptr.hbm [resolvable:$true] %s16_s14  ;;  %s19_s16 = int_to_ptr.vmem [resolvable:$true] %s18_s16 }
   0x2   :  { %s90_s18 = smov 8  }
   0x3   :  { %24 = dma.hbm_to_vmem [thread:$0]  %s17_s14, 256, %s19_s16, [#allocation4], %s89_s17, %s89_s17, %s90_s18  }
   0x4   :  { %86 = dma.done.wait [#allocation4], 256  }
   0x5   :  { %87 = vsyncadd [#allocation4], 4294967040  ;;  %v31_v0 = vld [vmem:[#allocation3] sm:$0xff]  ;;  %vm39_vm0 = vcmask 261120   ;;  %v32_v3 = vld [vmem:[#allocation3 + $0x8] sm:$0xff]  ;;  %v47_v7 = vstv %s126_s0  ;;  %vm50_vm1 = vcmask 7168  }
   0x6   :  { %v61_v1 = vld [vmem:[%s128_s2] ss:$0 sm:$0xff] }
   0x7   :  { %v37_v2 = vmul.f32 %v61_v1, %v31_v0  ;;  %v38_v5 = vmul.f32 %v61_v1, %v32_v3 }
   0x9   :  { %v40_v4 = vsel %vm39_vm0, %v37_v2, 0.0  ;;  %v43_v6 = vsel %vm39_vm0, %v38_v5, 0.0 }
   0xa   :  { %41 = vadd.xlane.f32.xlu0 %v40_v4 }
  0x12   :  { %44 = vadd.xlane.f32.xlu0 %v43_v6 }
  0x7d   :  { %v42_v8 = vpop.xlane.xlu0 %41 }
  0x7e   :  { %v48_v9 = vmul.f32 %v47_v7, %v42_v8 }
  0x80   :  { %51 = vst.msk [vmem:[%s129_s3] sm:$0xff] %vm50_vm1, %v48_v9 }
  0x85   :  { %v45_v10 = vpop.xlane.xlu0 %44 }
  0x86   :  { %v49_v11 = vmul.f32 %v47_v7, %v45_v10 }
  0x88   :  { %52 = vst.msk [vmem:[%s129_s3 + $0x8] sm:$0xff] %vm50_vm1, %v49_v11 }
  0x89   :  { %57 = vsyncpa [#allocation4], 1 }

</bundles_post_ra>
